<compile_context>
chip_gen: v7x
topology: tpu7x:2x2x1
jax: 0.10.0
libtpu: 0.0.40
codegen_flags: <defaults>
</compile_context>

<pallas_src>
import functools
import math

import jax
import jax.numpy as jnp
from jax.experimental import pallas as pl
from jax.experimental.pallas import tpu as pltpu

ARC_S = 64.0
ARC_M = 0.5


def _arcface_kernel(emb_ref, w_ref, lbl_ref, out_ref, *,
                    s, cos_m, sin_m, mm, threshold, tn):
    w = w_ref[...]                                       # (E, tn), compute dtype

    # Per-column inverse norm from the resident tile (f32 accumulate, EUP rsqrt).
    wsq = jnp.sum(jnp.square(w.astype(jnp.float32)), axis=0, keepdims=True)
    inv_norm = jax.lax.rsqrt(wsq + 1e-20)                # (1, tn); zero-padded cols stay finite

    cos = jnp.dot(emb_ref[...], w, preferred_element_type=jnp.float32)
    cos = cos * inv_norm                                 # (tm, tn) * (1, tn)
    cos = jnp.clip(cos, -1.0, 1.0)

    sin = jnp.sqrt(jnp.maximum(1.0 - cos * cos, 0.0))
    cos_theta_m = cos * cos_m - sin * sin_m
    keep = cos - mm                                      # fallback when theta + m > pi
    cos_theta_m = jnp.where(cos <= threshold, keep, cos_theta_m)

    tm = out_ref.shape[0]
    col = (jax.lax.broadcasted_iota(jnp.int32, (tm, tn), 1)
           + pl.program_id(0) * tn)                      # global class indices
    onehot = col == lbl_ref[...]                         # (tm, tn) vs (tm, 1) broadcast
    out_ref[...] = (jnp.where(onehot, cos_theta_m, cos) * s).astype(out_ref.dtype)


def _round_up(x, m):
    return ((x + m - 1) // m) * m


def arcface_forward(embeddings, kernel, label, *, s=ARC_S, m=ARC_M,
                    tm=None, tn=None,
                    compute_dtype=jnp.bfloat16, out_dtype=jnp.float32):
    """embeddings: (B, E), kernel: (E, C), label: (B,) int -> (B, C) out_dtype logits."""
    B, E = embeddings.shape
    E2, C = kernel.shape
    assert E == E2, (E, E2)

    # Matmul-input dtype.  NOTE: ideally the caller stores the kernel already in
    # compute_dtype so this is a no-op instead of a full E x C convert per call.
    if compute_dtype is not None:
        embeddings = embeddings.astype(compute_dtype)
        kernel = kernel.astype(compute_dtype)
    else:
        kernel = kernel.astype(embeddings.dtype)
    itemsize = jnp.dtype(embeddings.dtype).itemsize

    # Tile selection: whole batch resident if it fits comfortably in VMEM.
    if tm is None:
        tm = B if B * E * itemsize <= (4 << 20) else 256
    tm = min(tm, B)
    if tm < B and tm % 8 != 0:
        tm = _round_up(tm, 8)
    if tn is None:
        tn = min(1024, _round_up(C, 128))

    # Pad to tile multiples (padded weight cols are zero -> cos=0; padded labels
    # are -1 -> never hit the margin branch; padded rows/cols sliced off below).
    B_pad = B if tm == B else _round_up(B, tm)
    C_pad = _round_up(C, tn)
    if C_pad != C:
        kernel = jnp.pad(kernel, ((0, 0), (0, C_pad - C)))
    label2d = label.astype(jnp.int32)
    if B_pad != B:
        embeddings = jnp.pad(embeddings, ((0, B_pad - B), (0, 0)))
        label2d = jnp.pad(label2d, (0, B_pad - B), constant_values=-1)
    label2d = label2d.reshape(B_pad, 1)

    body = functools.partial(
        _arcface_kernel,
        s=float(s),
        cos_m=float(math.cos(m)),
        sin_m=float(math.sin(m)),
        mm=float(math.sin(m) * m),
        threshold=float(math.cos(math.pi - m)),
        tn=tn,
    )

    # VMEM budget: double-buffered emb/weight/out tiles + f32 temp for the norm.
    out_itemsize = jnp.dtype(out_dtype).itemsize
    est = (2 * (tm * E + E * tn) * itemsize
           + 2 * tm * tn * out_itemsize
           + E * tn * 4)
    vmem_limit = int(min(max(2 * est + (2 << 20), 32 << 20), 48 << 20))

    # Grid: class tiles outer, batch tiles inner.  With tm == B the embedding
    # block index is constant -> fetched from HBM once; weights streamed once.
    grid = (C_pad // tn, B_pad // tm)
    out = pl.pallas_call(
        body,
        out_shape=jax.ShapeDtypeStruct((B_pad, C_pad), out_dtype),
        grid=grid,
        in_specs=[
            pl.BlockSpec((tm, E), lambda j, i: (i, 0)),   # embeddings
            pl.BlockSpec((E, tn), lambda j, i: (0, j)),   # weight columns
            pl.BlockSpec((tm, 1), lambda j, i: (i, 0)),   # labels
        ],
        out_specs=pl.BlockSpec((tm, tn), lambda j, i: (i, j)),
        compiler_params=pltpu.CompilerParams(
            dimension_semantics=("parallel", "parallel"),
            vmem_limit_bytes=vmem_limit),
    )(embeddings, kernel, label2d)

    if B_pad != B or C_pad != C:
        out = out[:B, :C]
    return out


def init_arcface_kernel(key, embedding_size, classnum):
    """Deterministic replica of: uniform_(-1,1).renorm_(2, 1, 1e-5).mul_(1e5)."""
    w = jax.random.uniform(key, (embedding_size, classnum),
                           dtype=jnp.float32, minval=-1.0, maxval=1.0)
    col_norm = jnp.sqrt(jnp.sum(w * w, axis=0, keepdims=True))
    scale = jnp.minimum(1.0, 1e-5 / jnp.maximum(col_norm, 1e-30))
    return w * scale * 1e5


def arcface_reference(embeddings, kernel, label, s=ARC_S, m=ARC_M):
    kn = kernel / jnp.linalg.norm(kernel, axis=0, keepdims=True)
    cos = jnp.dot(embeddings, kn, precision=jax.lax.Precision.HIGHEST)
    cos = jnp.clip(cos, -1.0, 1.0)
    sin = jnp.sqrt(jnp.maximum(1.0 - cos * cos, 0.0))
    cos_theta_m = cos * math.cos(m) - sin * math.sin(m)
    keep = cos - math.sin(m) * m
    cos_theta_m = jnp.where(cos - math.cos(math.pi - m) <= 0.0, keep, cos_theta_m)
    onehot = jax.nn.one_hot(label, kernel.shape[1], dtype=jnp.bool_)
    return jnp.where(onehot, cos_theta_m, cos) * s


if __name__ == "__main__":
    # Small synthetic shapes consistent with Arcface(embedding_size, classnum).
    B, E, C = 8, 128, 512
    key = jax.random.PRNGKey(0)
    k_emb, k_w, k_lbl = jax.random.split(key, 3)

    embeddings = jax.random.normal(k_emb, (B, E), dtype=jnp.float32)
    # The module typically receives l2-normalized embeddings; normalize rows.
    embeddings = embeddings / jnp.linalg.norm(embeddings, axis=1, keepdims=True)
    kernel = init_arcface_kernel(k_w, E, C)
    label = jax.random.randint(k_lbl, (B,), 0, C, dtype=jnp.int32)

    ref = arcface_reference(embeddings, kernel, label)

    # f32 path: matches the PyTorch module closely.
    out_f32 = jax.block_until_ready(
        arcface_forward(embeddings, kernel, label, compute_dtype=jnp.float32))
    assert out_f32.shape == (B, C) and out_f32.dtype == jnp.float32
    err_f32 = float(jnp.max(jnp.abs(out_f32 - ref)))
    assert err_f32 < 2e-3, f"f32 max abs err {err_f32}"

    # Default bf16 path: halved weight HBM traffic, f32 accumulation; expect
    # small absolute quantization on the s=64-scaled logits.
    out_bf16 = jax.block_until_ready(arcface_forward(embeddings, kernel, label))
    err_bf16 = float(jnp.max(jnp.abs(out_bf16 - ref)))
    assert err_bf16 < 1.0, f"bf16 max abs err {err_bf16}"

    # Padding path: class count not 128-aligned, batch not 8-aligned.
    B2, C2 = 6, 300
    e2 = jax.random.normal(jax.random.PRNGKey(1), (B2, E), dtype=jnp.float32)
    e2 = e2 / jnp.linalg.norm(e2, axis=1, keepdims=True)
    w2 = init_arcface_kernel(jax.random.PRNGKey(2), E, C2)
    l2 = jax.random.randint(jax.random.PRNGKey(3), (B2,), 0, C2, dtype=jnp.int32)
    out2 = jax.block_until_ready(
        arcface_forward(e2, w2, l2, compute_dtype=jnp.float32))
    ref2 = arcface_reference(e2, w2, l2)
    assert out2.shape == (B2, C2)
    err2 = float(jnp.max(jnp.abs(out2 - ref2)))
    assert err2 < 2e-3, f"padded f32 max abs err {err2}"

    print("KERNEL_OK")
</pallas_src>

<mosaic_0001>
module attributes {stable_mosaic.version = 11 : i64} {
  func.func @_arcface_kernel(%arg0: i32, %arg1: i32, %arg2: memref<8x128xf32, #tpu.memory_space<vmem>>, %arg3: memref<128x512xf32, #tpu.memory_space<vmem>>, %arg4: memref<8x1xi32, #tpu.memory_space<vmem>>, %arg5: memref<8x512xf32, #tpu.memory_space<vmem>>) attributes {dimension_semantics = [#tpu.dimension_semantics<parallel>, #tpu.dimension_semantics<parallel>], iteration_bounds = array<i64: 1, 1>, scalar_prefetch = 0 : i64, scratch_operands = 0 : i64, tpu.core_type = #tpu.core_type<tc>, window_params = [{transform_indices = @transform_0, window_bounds = array<i64: 8, 128>}, {transform_indices = @transform_1, window_bounds = array<i64: 128, 512>}, {transform_indices = @transform_2, window_bounds = array<i64: 8, 1>}, {transform_indices = @transform_3, window_bounds = array<i64: 8, 512>}]} {
    %c0 = arith.constant 0 : index
    %c0_0 = arith.constant 0 : index
    %0 = vector.load %arg3[%c0, %c0_0] : memref<128x512xf32, #tpu.memory_space<vmem>>, vector<128x512xf32>
    %1 = arith.mulf %0, %0 : vector<128x512xf32>
    %cst = arith.constant dense<0.000000e+00> : vector<512xf32>
    %2 = vector.multi_reduction <add>, %1, %cst [0] : vector<128x512xf32> to vector<512xf32>
    %3 = vector.shape_cast %2 : vector<512xf32> to vector<1x512xf32>
    %cst_1 = arith.constant 9.99999968E-21 : f32
    %4 = vector.broadcast %cst_1 : f32 to vector<1x512xf32>
    %5 = arith.addf %3, %4 : vector<1x512xf32>
    %6 = math.rsqrt %5 : vector<1x512xf32>
    %c0_2 = arith.constant 0 : index
    %c0_3 = arith.constant 0 : index
    %7 = vector.load %arg2[%c0_2, %c0_3] : memref<8x128xf32, #tpu.memory_space<vmem>>, vector<8x128xf32>
    %cst_4 = arith.constant dense<0.000000e+00> : vector<8x512xf32>
    %8 = tpu.matmul %7, %0, %cst_4 {dimension_numbers = #tpu.dot_dimension_numbers<[1], [0], [0], [1], [0, 0, 1, 1], [], []>} : vector<8x128xf32>, vector<128x512xf32>, vector<8x512xf32> -> vector<8x512xf32>
    %9 = vector.broadcast %6 : vector<1x512xf32> to vector<8x512xf32>
    %10 = arith.mulf %8, %9 : vector<8x512xf32>
    %cst_5 = arith.constant -1.000000e+00 : f32
    %cst_6 = arith.constant 1.000000e+00 : f32
    %11 = vector.broadcast %cst_5 : f32 to vector<8x512xf32>
    %12 = arith.maximumf %11, %10 : vector<8x512xf32>
    %13 = vector.broadcast %cst_6 : f32 to vector<8x512xf32>
    %14 = arith.minimumf %13, %12 : vector<8x512xf32>
    %15 = arith.mulf %14, %14 : vector<8x512xf32>
    %cst_7 = arith.constant 1.000000e+00 : f32
    %16 = vector.broadcast %cst_7 : f32 to vector<8x512xf32>
    %17 = arith.subf %16, %15 : vector<8x512xf32>
    %cst_8 = arith.constant 0.000000e+00 : f32
    %18 = vector.broadcast %cst_8 : f32 to vector<8x512xf32>
    %19 = arith.maximumf %17, %18 : vector<8x512xf32>
    %20 = math.sqrt %19 : vector<8x512xf32>
    %cst_9 = arith.constant 0.87758255 : f32
    %21 = vector.broadcast %cst_9 : f32 to vector<8x512xf32>
    %22 = arith.mulf %14, %21 : vector<8x512xf32>
    %cst_10 = arith.constant 0.47942555 : f32
    %23 = vector.broadcast %cst_10 : f32 to vector<8x512xf32>
    %24 = arith.mulf %20, %23 : vector<8x512xf32>
    %25 = arith.subf %22, %24 : vector<8x512xf32>
    %cst_11 = arith.constant 0.239712775 : f32
    %26 = vector.broadcast %cst_11 : f32 to vector<8x512xf32>
    %27 = arith.subf %14, %26 : vector<8x512xf32>
    %cst_12 = arith.constant -0.87758255 : f32
    %28 = vector.broadcast %cst_12 : f32 to vector<8x512xf32>
    %29 = arith.cmpf ole, %14, %28 : vector<8x512xf32>
    %30 = arith.select %29, %27, %25 : vector<8x512xi1>, vector<8x512xf32>
    %31 = tpu.iota {dimensions = array<i32: 1>} : vector<8x512xi32>
    %c512_i32 = arith.constant 512 : i32
    %32 = arith.muli %arg0, %c512_i32 : i32
    %33 = vector.broadcast %32 : i32 to vector<8x512xi32>
    %34 = arith.addi %31, %33 : vector<8x512xi32>
    %c0_13 = arith.constant 0 : index
    %c0_14 = arith.constant 0 : index
    %35 = vector.load %arg4[%c0_13, %c0_14] : memref<8x1xi32, #tpu.memory_space<vmem>>, vector<8x1xi32>
    %36 = vector.broadcast %35 : vector<8x1xi32> to vector<8x512xi32>
    %37 = arith.cmpi eq, %34, %36 : vector<8x512xi32>
    %38 = arith.select %37, %30, %14 : vector<8x512xi1>, vector<8x512xf32>
    %cst_15 = arith.constant 6.400000e+01 : f32
    %39 = vector.broadcast %cst_15 : f32 to vector<8x512xf32>
    %40 = arith.mulf %38, %39 : vector<8x512xf32>
    %c0_16 = arith.constant 0 : index
    %c0_17 = arith.constant 0 : index
    %41 = vector.load %arg5[%c0_16, %c0_17] : memref<8x512xf32, #tpu.memory_space<vmem>>, vector<8x512xf32>
    tpu.vector_store %arg5[%c0_16, %c0_17], %40 {strides = array<i32>} : memref<8x512xf32, #tpu.memory_space<vmem>>, vector<8x512xf32>,
    return
  }
  func.func @transform_0(%arg0: i32, %arg1: i32) -> (i32, i32) {
    %c0_i32 = arith.constant 0 : i32
    %c0_i32_0 = arith.constant 0 : i32
    return %arg1, %c0_i32 : i32, i32
  }
  func.func @transform_1(%arg0: i32, %arg1: i32) -> (i32, i32) {
    %c0_i32 = arith.constant 0 : i32
    %c0_i32_0 = arith.constant 0 : i32
    return %c0_i32, %arg0 : i32, i32
  }
  func.func @transform_2(%arg0: i32, %arg1: i32) -> (i32, i32) {
    %c0_i32 = arith.constant 0 : i32
    %c0_i32_0 = arith.constant 0 : i32
    return %arg1, %c0_i32 : i32, i32
  }
  func.func @transform_3(%arg0: i32, %arg1: i32) -> (i32, i32) {
    %c0_i32 = arith.constant 0 : i32
    return %arg1, %arg0 : i32, i32
  }
}

</mosaic_0001>

<bundles_post_ra>
// kernel: tpu_custom_call.1
= control target key start
LH: loop header
LB: loop body
LE: loop exit
PB: predicated region body
PF: predicated region fallthrough
CT: control target
= control target key end

     0   :  { %8 = vsyncpa [#allocation3], 0  ;;  %s767_s0 = inlined_call_operand.vmem [shape: f32[8,128], index: 0, kind: input, shape index: {}]   ;;  %s768_s1 = inlined_call_operand.hbm [shape: f32[128,512], index: 1, kind: input, shape index: {}]   ;;  %s769_s2 = inlined_call_operand.vmem [shape: s32[8,1], index: 2, kind: input, shape index: {}]   ;;  %s770_s3 = inlined_call_operand.hbm [shape: f32[8,512], index: 3, kind: output, shape index: {}]  }
   0x1   :  { %9 = vsyncpa [#allocation4], 0  ;;  %s657_s12 = smov [#allocation2]   ;;  %s609_s16 = scalar_lea.hbm %s768_s1, 8192 }
   0x2   :  { %s17_s13 = sshll.u32 %s657_s12, 4  ;;  %p610_p0 = scmp.ne.s32.totalorder %s768_s1, %s609_s16  ;;  %s18_s13 = int_to_ptr.vmem [resolvable:$true] %s17_s13 }
   0x3   :  { %p613_p1 = scmp.lt.u32.totalorder %s609_s16, %s768_s1 }
   0x5   :  { %p615_p2 = pnand %p613_p1, %p610_p0 }
   0x7   :  { %618 = shalt.err (!%p615_p2)
}
   0x8   :  { %s619_s21 = scalar_lea.vmem %s18_s13, 8192  ;;  %p624_p4 = scmp.lt.s32.totalorder %s18_s13, %s18_s13 }
   0x9   :  { %p620_p3 = scmp.ne.s32.totalorder %s18_s13, %s619_s21  ;;  %p625_p5 = scmp.lt.s32.totalorder %s619_s21, %s619_s21 }
   0xb   :  { %p626_p6 = por %p625_p5, %p624_p4 }
   0xd   :  { %p627_p7 = pnand %p626_p6, %p620_p3 }
   0xf   :  { %630 = shalt.err (!%p627_p7)
}
  0x10   :  { %s658_s22 = smov 512   ;;  %s659_s23 = smov 32  }
  0x11   :  { %23 = dma.hbm_to_vmem [thread:$0]  %s768_s1, 8192, %s18_s13, [#allocation3], %s658_s22, %s658_s22, %s659_s23  }
  0x12   :  { %653 = dma.done.wait [#allocation3], 8192  }
  0x13   :  { %654 = vsyncadd [#allocation3], 4294959104  ;;  %v660_v0 = vmov 0.0   ;;  %v661_v1 = vmov 0   ;;  %v30_v2 = vld [vmem:[#allocation2 + $0x8] sm:$0xff]  ;;  %v32_v4 = vld [vmem:[#allocation2 + $0x18] sm:$0xff] }
  0x14   :  { %314 = vmatprep.mubr.f32.mxu0 %v660_v0  ;;  %385 = vmatprep.mubr.f32.mxu1 %v660_v0  ;;  %v34_v3 = vld [vmem:[#allocation2 + $0x28] sm:$0xff]  ;;  %v94_v5 = vmul.f32 %v30_v2, %v30_v2  ;;  %v36_v8 = vld [vmem:[#allocation2 + $0x38] sm:$0xff]  ;;  %v96_v9 = vmul.f32 %v32_v4, %v32_v4  ;;  %v29_v10 = vld [vmem:[#allocation2] sm:$0xff] }
  0x15   :  { %592 = vset.pattern.permute.xlu0 %v661_v1  ;;  %v98_v6 = vmul.f32 %v34_v3, %v34_v3  ;;  %v522_v7 = vpack.c.bf16 %v34_v3, %v30_v2  ;;  %v33_v11 = vld [vmem:[#allocation2 + $0x20] sm:$0xff]  ;;  %v100_v12 = vmul.f32 %v36_v8, %v36_v8  ;;  %v554_v13 = vpack.c.bf16 %v36_v8, %v32_v4  ;;  %v31_v16 = vld [vmem:[#allocation2 + $0x10] sm:$0xff]  ;;  %v38_v18 = vld [vmem:[#allocation2 + $0x48] sm:$0xff] }
  0x16   :  { %v93_v14 = vmul.f32 %v29_v10, %v29_v10  ;;  %v97_v15 = vmul.f32 %v33_v11, %v33_v11  ;;  %v35_v17 = vld [vmem:[#allocation2 + $0x30] sm:$0xff]  ;;  %v524_v20 = vpack.c.bf16 %v33_v11, %v29_v10  ;;  %v95_v21 = vmul.f32 %v31_v16, %v31_v16  ;;  %v42_v23 = vld [vmem:[#allocation2 + $0x68] sm:$0xff]  ;;  %v40_v24 = vld [vmem:[#allocation2 + $0x58] sm:$0xff] }
  0x17   :  { %v178_v19 = vadd.f32 %v98_v6, %v94_v5  ;;  %523 = vmatprep.subr.bf16.mxu0 %v522_v7  ;;  %v99_v22 = vmul.f32 %v35_v17, %v35_v17  ;;  %v44_v25 = vld [vmem:[#allocation2 + $0x78] sm:$0xff]  ;;  %v220_v26 = vadd.f32 %v100_v12, %v96_v9  ;;  %555 = vmatprep.subr.bf16.mxu1 %v554_v13  ;;  %v37_v30 = vld [vmem:[#allocation2 + $0x40] sm:$0xff]  ;;  %v39_v36 = vld [vmem:[#allocation2 + $0x50] sm:$0xff] }
  0x18   :  { %v157_v27 = vadd.f32 %v97_v15, %v93_v14  ;;  %v556_v28 = vpack.c.bf16 %v35_v17, %v31_v16  ;;  %v102_v29 = vmul.f32 %v38_v18, %v38_v18  ;;  %v41_v31 = vld [vmem:[#allocation2 + $0x60] sm:$0xff]  ;;  %525 = vmatpush1.bf16.msra.mxu0 %v524_v20  ;;  %v106_v33 = vmul.f32 %v42_v23, %v42_v23  ;;  %v43_v37 = vld [vmem:[#allocation2 + $0x70] sm:$0xff]  ;;  %v46_v46 = vld [vmem:[#allocation2 + $0x88] sm:$0xff] }
  0x19   :  { %v199_v32 = vadd.f32 %v99_v22, %v95_v21  ;;  %v526_v34 = vpack.c.bf16 %v42_v23, %v38_v18  ;;  %v104_v35 = vmul.f32 %v40_v24, %v40_v24  ;;  %v108_v39 = vmul.f32 %v44_v25, %v44_v25  ;;  %v50_v47 = vld [vmem:[#allocation2 + $0xa8] sm:$0xff]  ;;  %v48_v52 = vld [vmem:[#allocation2 + $0x98] sm:$0xff]  ;;  %v45_v58 = vld [vmem:[#allocation2 + $0x80] sm:$0xff] }
  0x1a   :  { %557 = vmatpush1.bf16.msra.mxu1 %v556_v28  ;;  %v179_v38 = vadd.f32 %v178_v19, %v102_v29  ;;  %v558_v40 = vpack.c.bf16 %v44_v25, %v40_v24  ;;  %v101_v41 = vmul.f32 %v37_v30, %v37_v30  ;;  %v105_v43 = vmul.f32 %v41_v31, %v41_v31  ;;  %v52_v53 = vld [vmem:[#allocation2 + $0xb8] sm:$0xff]  ;;  %v49_v59 = vld [vmem:[#allocation2 + $0xa0] sm:$0xff]  ;;  %v47_v0 = vld [vmem:[#allocation2 + $0x90] sm:$0xff] }
  0x1b   :  { %527 = vmatprep.subr.bf16.mxu0 %v526_v34  ;;  %v221_v42 = vadd.f32 %v220_v26, %v104_v35  ;;  %v528_v44 = vpack.c.bf16 %v41_v31, %v37_v30  ;;  %v103_v45 = vmul.f32 %v39_v36, %v39_v36  ;;  %v107_v50 = vmul.f32 %v43_v37, %v43_v37  ;;  %v51_v1 = vld [vmem:[#allocation2 + $0xb0] sm:$0xff]  ;;  %v54_v10 = vld [vmem:[#allocation2 + $0xc8] sm:$0xff]  ;;  %v56_v16 = vld [vmem:[#allocation2 + $0xd8] sm:$0xff] }
  0x1c   :  { %v180_v48 = vadd.f32 %v179_v38, %v106_v33  ;;  %559 = vmatprep.subr.bf16.mxu1 %v558_v40  ;;  %v158_v49 = vadd.f32 %v157_v27, %v101_v41  ;;  %v560_v51 = vpack.c.bf16 %v43_v37, %v39_v36  ;;  %v110_v56 = vmul.f32 %v46_v46, %v46_v46  ;;  %v58_v11 = vld [vmem:[#allocation2 + $0xe8] sm:$0xff]  ;;  %v60_v17 = vld [vmem:[#allocation2 + $0xf8] sm:$0xff]  ;;  %v53_v22 = vld [vmem:[#allocation2 + $0xc0] sm:$0xff] }
  0x1d   :  { %v222_v54 = vadd.f32 %v221_v42, %v108_v39  ;;  %529 = vmatpush1.bf16.msra.mxu0 %v528_v44  ;;  %v200_v55 = vadd.f32 %v199_v32, %v103_v45  ;;  %v114_v57 = vmul.f32 %v50_v47, %v50_v47  ;;  %v530_v61 = vpack.c.bf16 %v50_v47, %v46_v46  ;;  %v57_v23 = vld [vmem:[#allocation2 + $0xe0] sm:$0xff]  ;;  %v55_v28 = vld [vmem:[#allocation2 + $0xd0] sm:$0xff]  ;;  %v62_v38 = vld [vmem:[#allocation2 + $0x108] sm:$0xff] }
  0x1e   :  { %v159_v60 = vadd.f32 %v158_v49, %v105_v43  ;;  %561 = vmatpush1.bf16.msra.mxu1 %v560_v51  ;;  %v112_v62 = vmul.f32 %v48_v52, %v48_v52  ;;  %v116_v63 = vmul.f32 %v52_v53, %v52_v53  ;;  %v181_v3 = vadd.f32 %v180_v48, %v110_v56  ;;  %v59_v29 = vld [vmem:[#allocation2 + $0xf0] sm:$0xff]  ;;  %v66_v39 = vld [vmem:[#allocation2 + $0x128] sm:$0xff]  ;;  %v64_v44 = vld [vmem:[#allocation2 + $0x118] sm:$0xff] }
  0x1f   :  { %v201_v2 = vadd.f32 %v200_v55, %v107_v50  ;;  %v562_v4 = vpack.c.bf16 %v52_v53, %v48_v52  ;;  %v109_v5 = vmul.f32 %v45_v58, %v45_v58  ;;  %531 = vmatprep.subr.bf16.mxu0 %v530_v61  ;;  %v113_v7 = vmul.f32 %v49_v59, %v49_v59  ;;  %v68_v45 = vld [vmem:[#allocation2 + $0x138] sm:$0xff]  ;;  %v61_v50 = vld [vmem:[#allocation2 + $0x100] sm:$0xff]  ;;  %v63_v56 = vld [vmem:[#allocation2 + $0x110] sm:$0xff] }
  0x20   :  { %v223_v6 = vadd.f32 %v222_v54, %v112_v62  ;;  %v532_v8 = vpack.c.bf16 %v49_v59, %v45_v58  ;;  %v111_v9 = vmul.f32 %v47_v0, %v47_v0  ;;  %v182_v12 = vadd.f32 %v181_v3, %v114_v57  ;;  %v65_v51 = vld [vmem:[#allocation2 + $0x120] sm:$0xff]  ;;  %v67_v57 = vld [vmem:[#allocation2 + $0x130] sm:$0xff]  ;;  %v74_v3 = vld [vmem:[#allocation2 + $0x168] sm:$0xff] }
  0x21   :  { %563 = vmatprep.subr.bf16.mxu1 %v562_v4  ;;  %v160_v13 = vadd.f32 %v159_v60, %v109_v5  ;;  %v115_v14 = vmul.f32 %v51_v1, %v51_v1  ;;  %v564_v15 = vpack.c.bf16 %v51_v1, %v47_v0  ;;  %v118_v20 = vmul.f32 %v54_v10, %v54_v10 }
  0x22   :  { %v224_v18 = vadd.f32 %v223_v6, %v116_v63  ;;  %533 = vmatpush1.bf16.msra.mxu0 %v532_v8  ;;  %v202_v19 = vadd.f32 %v201_v2, %v111_v9  ;;  %v122_v21 = vmul.f32 %v58_v11, %v58_v11  ;;  %v534_v25 = vpack.c.bf16 %v58_v11, %v54_v10  ;;  %v70_v2 = vld [vmem:[#allocation2 + $0x148] sm:$0xff]  ;;  %v72_v8 = vld [vmem:[#allocation2 + $0x158] sm:$0xff]  ;;  %v479_v10 = vld [vmem:[%s769_s2] sm:$0xff] }
  0x23   :  { %v161_v24 = vadd.f32 %v160_v13, %v113_v7  ;;  %565 = vmatpush1.bf16.msra.mxu1 %v564_v15  ;;  %v120_v26 = vmul.f32 %v56_v16, %v56_v16  ;;  %v124_v27 = vmul.f32 %v60_v17, %v60_v17  ;;  %v183_v31 = vadd.f32 %v182_v12, %v118_v20  ;;  %v76_v9 = vld [vmem:[#allocation2 + $0x178] sm:$0xff]  ;;  %v69_v15 = vld [vmem:[#allocation2 + $0x140] sm:$0xff] }
  0x24   :  { %v203_v30 = vadd.f32 %v202_v19, %v115_v14  ;;  %v566_v32 = vpack.c.bf16 %v60_v17, %v56_v16  ;;  %v117_v33 = vmul.f32 %v53_v22, %v53_v22  ;;  %535 = vmatprep.subr.bf16.mxu0 %v534_v25  ;;  %v121_v35 = vmul.f32 %v57_v23, %v57_v23  ;;  %v73_v16 = vld [vmem:[#allocation2 + $0x160] sm:$0xff] }
  0x25   :  { %v225_v34 = vadd.f32 %v224_v18, %v120_v26  ;;  %v536_v36 = vpack.c.bf16 %v57_v23, %v53_v22  ;;  %v119_v37 = vmul.f32 %v55_v28, %v55_v28  ;;  %v184_v40 = vadd.f32 %v183_v31, %v122_v21  ;;  %v71_v21 = vld [vmem:[#allocation2 + $0x150] sm:$0xff]  ;;  %481 = vperm.xlu0 %592, %v479_v10   ;;  %v78_v31 = vld [vmem:[#allocation2 + $0x188] sm:$0xff] }
  0x26   :  { %567 = vmatprep.subr.bf16.mxu1 %v566_v32  ;;  %v162_v41 = vadd.f32 %v161_v24, %v117_v33  ;;  %v123_v42 = vmul.f32 %v59_v29, %v59_v29  ;;  %v568_v43 = vpack.c.bf16 %v59_v29, %v55_v28  ;;  %v126_v48 = vmul.f32 %v62_v38, %v62_v38  ;;  %v75_v22 = vld [vmem:[#allocation2 + $0x170] sm:$0xff]  ;;  %v82_v32 = vld [vmem:[#allocation2 + $0x1a8] sm:$0xff] }
  0x27   :  { %v226_v46 = vadd.f32 %v225_v34, %v124_v27  ;;  %537 = vmatpush1.bf16.msra.mxu0 %v536_v36  ;;  %v204_v47 = vadd.f32 %v203_v30, %v119_v37  ;;  %v130_v49 = vmul.f32 %v66_v39, %v66_v39  ;;  %v538_v53 = vpack.c.bf16 %v66_v39, %v62_v38  ;;  %v80_v37 = vld [vmem:[#allocation2 + $0x198] sm:$0xff] }
  0x28   :  { %v163_v52 = vadd.f32 %v162_v41, %v121_v35  ;;  %569 = vmatpush1.bf16.msra.mxu1 %v568_v43  ;;  %v128_v54 = vmul.f32 %v64_v44, %v64_v44  ;;  %v132_v55 = vmul.f32 %v68_v45, %v68_v45  ;;  %v185_v59 = vadd.f32 %v184_v40, %v126_v48  ;;  %v84_v38 = vld [vmem:[#allocation2 + $0x1b8] sm:$0xff]  ;;  %v77_v43 = vld [vmem:[#allocation2 + $0x180] sm:$0xff] }
  0x29   :  { %v205_v58 = vadd.f32 %v204_v47, %v123_v42  ;;  %v570_v60 = vpack.c.bf16 %v68_v45, %v64_v44  ;;  %v125_v61 = vmul.f32 %v61_v50, %v61_v50  ;;  %539 = vmatprep.subr.bf16.mxu0 %v538_v53  ;;  %v129_v63 = vmul.f32 %v65_v51, %v65_v51  ;;  %v81_v44 = vld [vmem:[#allocation2 + $0x1a0] sm:$0xff] }
  0x2a   :  { %v227_v62 = vadd.f32 %v226_v46, %v128_v54  ;;  %v540_v0 = vpack.c.bf16 %v65_v51, %v61_v50  ;;  %v127_v1 = vmul.f32 %v63_v56, %v63_v56  ;;  %v186_v4 = vadd.f32 %v185_v59, %v130_v49  ;;  %v79_v49 = vld [vmem:[#allocation2 + $0x190] sm:$0xff]  ;;  %v86_v59 = vld [vmem:[#allocation2 + $0x1c8] sm:$0xff] }
  0x2b   :  { %571 = vmatprep.subr.bf16.mxu1 %v570_v60  ;;  %v164_v5 = vadd.f32 %v163_v52, %v125_v61  ;;  %v131_v6 = vmul.f32 %v67_v57, %v67_v57  ;;  %v572_v7 = vpack.c.bf16 %v67_v57, %v63_v56  ;;  %v134_v13 = vmul.f32 %v70_v2, %v70_v2  ;;  %v83_v50 = vld [vmem:[#allocation2 + $0x1b0] sm:$0xff]  ;;  %v90_v60 = vld [vmem:[#allocation2 + $0x1e8] sm:$0xff] }
  0x2c   :  { %v228_v11 = vadd.f32 %v227_v62, %v132_v55  ;;  %541 = vmatpush1.bf16.msra.mxu0 %v540_v0  ;;  %v206_v12 = vadd.f32 %v205_v58, %v127_v1  ;;  %v138_v14 = vmul.f32 %v74_v3, %v74_v3  ;;  %v542_v18 = vpack.c.bf16 %v74_v3, %v70_v2  ;;  %v88_v1 = vld [vmem:[#allocation2 + $0x1d8] sm:$0xff] }
  0x2d   :  { %v165_v17 = vadd.f32 %v164_v5, %v129_v63  ;;  %573 = vmatpush1.bf16.msra.mxu1 %v572_v7  ;;  %v136_v19 = vmul.f32 %v72_v8, %v72_v8  ;;  %v140_v20 = vmul.f32 %v76_v9, %v76_v9  ;;  %v187_v24 = vadd.f32 %v186_v4, %v134_v13  ;;  %v92_v2 = vld [vmem:[#allocation2 + $0x1f8] sm:$0xff]  ;;  %v85_v7 = vld [vmem:[#allocation2 + $0x1c0] sm:$0xff]  ;;  %v87_v13 = vld [vmem:[#allocation2 + $0x1d0] sm:$0xff] }
  0x2e   :  { %v207_v23 = vadd.f32 %v206_v12, %v131_v6  ;;  %v574_v25 = vpack.c.bf16 %v76_v9, %v72_v8  ;;  %v133_v26 = vmul.f32 %v69_v15, %v69_v15  ;;  %543 = vmatprep.subr.bf16.mxu0 %v542_v18  ;;  %v137_v28 = vmul.f32 %v73_v16, %v73_v16  ;;  %v89_v8 = vld [vmem:[#allocation2 + $0x1e0] sm:$0xff] }
  0x2f   :  { %v229_v27 = vadd.f32 %v228_v11, %v136_v19  ;;  %v544_v29 = vpack.c.bf16 %v73_v16, %v69_v15  ;;  %v135_v30 = vmul.f32 %v71_v21, %v71_v21  ;;  %v188_v33 = vadd.f32 %v187_v24, %v138_v14  ;;  %v91_v14 = vld [vmem:[#allocation2 + $0x1f0] sm:$0xff] }
  0x30   :  { %575 = vmatprep.subr.bf16.mxu1 %v574_v25  ;;  %v166_v34 = vadd.f32 %v165_v17, %v133_v26  ;;  %v139_v35 = vmul.f32 %v75_v22, %v75_v22  ;;  %v576_v36 = vpack.c.bf16 %v75_v22, %v71_v21  ;;  %v142_v41 = vmul.f32 %v78_v31, %v78_v31 }
  0x31   :  { %v230_v39 = vadd.f32 %v229_v27, %v140_v20  ;;  %545 = vmatpush1.bf16.msra.mxu0 %v544_v29  ;;  %v208_v40 = vadd.f32 %v207_v23, %v135_v30  ;;  %v146_v42 = vmul.f32 %v82_v32, %v82_v32  ;;  %v546_v46 = vpack.c.bf16 %v82_v32, %v78_v31  ;;  %v249_v29 = vld [vmem:[%s767_s0] sm:$0xff]  ;;  %s662_s0 = smov [#allocation5]  }
  0x32   :  { %v167_v45 = vadd.f32 %v166_v34, %v137_v28  ;;  %577 = vmatpush1.bf16.msra.mxu1 %v576_v36  ;;  %v144_v47 = vmul.f32 %v80_v37, %v80_v37  ;;  %v148_v48 = vmul.f32 %v84_v38, %v84_v38  ;;  %v189_v52 = vadd.f32 %v188_v33, %v142_v41  ;;  %s505_s28 = sshll.u32 %s662_s0, 4  ;;  %s506_s28 = int_to_ptr.vmem [resolvable:$true] %s505_s28 }
  0x33   :  { %v209_v51 = vadd.f32 %v208_v40, %v139_v35  ;;  %v578_v53 = vpack.c.bf16 %v84_v38, %v80_v37  ;;  %v141_v54 = vmul.f32 %v77_v43, %v77_v43  ;;  %547 = vmatprep.subr.bf16.mxu0 %v546_v46  ;;  %v145_v56 = vmul.f32 %v81_v44, %v81_v44  ;;  %s631_s29 = scalar_lea.vmem %s506_s28, 512  ;;  %p636_p9 = scmp.lt.s32.totalorder %s506_s28, %s506_s28 }
  0x34   :  { %v231_v55 = vadd.f32 %v230_v39, %v144_v47  ;;  %v548_v57 = vpack.c.bf16 %v81_v44, %v77_v43  ;;  %v143_v58 = vmul.f32 %v79_v49, %v79_v49  ;;  %v190_v61 = vadd.f32 %v189_v52, %v146_v42  ;;  %p632_p8 = scmp.ne.s32.totalorder %s506_s28, %s631_s29  ;;  %p637_p10 = scmp.lt.s32.totalorder %s631_s29, %s631_s29 }
  0x35   :  { %579 = vmatprep.subr.bf16.mxu1 %v578_v53  ;;  %v168_v62 = vadd.f32 %v167_v45, %v141_v54  ;;  %v147_v63 = vmul.f32 %v83_v50, %v83_v50  ;;  %v580_v0 = vpack.c.bf16 %v83_v50, %v79_v49  ;;  %v150_v5 = vmul.f32 %v86_v59, %v86_v59 }
  0x36   :  { %v232_v3 = vadd.f32 %v231_v55, %v148_v48  ;;  %549 = vmatpush1.bf16.msra.mxu0 %v548_v57  ;;  %v210_v4 = vadd.f32 %v209_v51, %v143_v58  ;;  %v154_v6 = vmul.f32 %v90_v60, %v90_v60  ;;  %v550_v10 = vpack.c.bf16 %v90_v60, %v86_v59  ;;  %p638_p11 = por %p637_p10, %p636_p9 }
  0x37   :  { %v169_v9 = vadd.f32 %v168_v62, %v145_v56  ;;  %581 = vmatpush1.bf16.msra.mxu1 %v580_v0  ;;  %v152_v11 = vmul.f32 %v88_v1, %v88_v1  ;;  %v156_v12 = vmul.f32 %v92_v2, %v92_v2  ;;  %v191_v16 = vadd.f32 %v190_v61, %v150_v5 }
  0x38   :  { %v211_v15 = vadd.f32 %v210_v4, %v147_v63  ;;  %v582_v17 = vpack.c.bf16 %v92_v2, %v88_v1  ;;  %v149_v18 = vmul.f32 %v85_v7, %v85_v7  ;;  %551 = vmatprep.subr.bf16.mxu0 %v550_v10  ;;  %v153_v20 = vmul.f32 %v89_v8, %v89_v8  ;;  %p639_p12 = pnand %p638_p11, %p632_p8 }
  0x39   :  { %v233_v19 = vadd.f32 %v232_v3, %v152_v11  ;;  %v552_v21 = vpack.c.bf16 %v89_v8, %v85_v7  ;;  %v151_v22 = vmul.f32 %v87_v13, %v87_v13  ;;  %v192_v23 = vadd.f32 %v191_v16, %v154_v6 }
  0x3a   :  { %583 = vmatprep.subr.bf16.mxu1 %v582_v17  ;;  %v170_v24 = vadd.f32 %v169_v9, %v149_v18  ;;  %v155_v25 = vmul.f32 %v91_v14, %v91_v14  ;;  %v584_v26 = vpack.c.bf16 %v91_v14, %v87_v13 }
  0x3b   :  { %v234_v27 = vadd.f32 %v233_v19, %v156_v12  ;;  %553 = vmatpush1.bf16.msra.mxu0 %v552_v21  ;;  %v212_v28 = vadd.f32 %v211_v15, %v151_v22  ;;  %v193_v34 = vrot.slane %v192_v23, 4  ;;  %v468_v21 = vlaneseq }
  0x3c   :  { %v171_v30 = vadd.f32 %v170_v24, %v153_v20  ;;  %585 = vmatpush1.bf16.msra.mxu1 %v584_v26 }
  0x3d   :  { %v213_v31 = vadd.f32 %v212_v28, %v155_v25  ;;  %v235_v35 = vrot.slane %v234_v27, 4  ;;  %v194_v38 = vadd.f32 %v193_v34, %v192_v23  ;;  %v469_v25 = vand.u32 127, %v468_v21 }
  0x3e   :  { %315 = vmatmul.mubr.f32.vlgmr.msra.gmra.mrb[0].mxu0 %v249_v29  ;;  %v172_v32 = vrot.slane %v171_v30, 4 }
  0x3f   :  { %386 = vmatmul.mubr.f32.vlgmr.msra.gmra.mrb[0].mxu1 %v249_v29  ;;  %v214_v33 = vrot.slane %v213_v31, 4  ;;  %v236_v39 = vadd.f32 %v235_v35, %v234_v27  ;;  %v195_v42 = vrot.slane %v194_v38, 2  ;;  %v470_v26 = vadd.s32 128, %v469_v25 }
  0x40   :  { %v173_v36 = vadd.f32 %v172_v32, %v171_v30  ;;  %v719_v28 = vadd.s32 256, %v469_v25  ;;  %v721_v29 = vadd.s32 384, %v469_v25 }
  0x41   :  { %v215_v37 = vadd.f32 %v214_v33, %v213_v31  ;;  %v237_v43 = vrot.slane %v236_v39, 2  ;;  %v196_v46 = vadd.f32 %v195_v42, %v194_v38 }
  0x42   :  { %v174_v40 = vrot.slane %v173_v36, 2 }
  0x43   :  { %v216_v41 = vrot.slane %v215_v37, 2  ;;  %v238_v47 = vadd.f32 %v237_v43, %v236_v39  ;;  %v197_v50 = vrot.slane %v196_v46, 1 }
  0x44   :  { %v175_v44 = vadd.f32 %v174_v40, %v173_v36 }
  0x45   :  { %v217_v45 = vadd.f32 %v216_v41, %v215_v37  ;;  %v239_v51 = vrot.slane %v238_v47, 1  ;;  %v198_v54 = vadd.f32 %v197_v50, %v196_v46 }
  0x46   :  { %v176_v48 = vrot.slane %v175_v44, 1 }
  0x47   :  { %v218_v49 = vrot.slane %v217_v45, 1  ;;  %v240_v55 = vadd.f32 %v239_v51, %v238_v47  ;;  %v242_v58 = vadd.f32 1e-20, %v198_v54 }
  0x48   :  { %v177_v52 = vadd.f32 %v176_v48, %v175_v44 }
  0x49   :  { %v219_v53 = vadd.f32 %v218_v49, %v217_v45  ;;  %v244_v59 = vadd.f32 1e-20, %v240_v55 }
  0x4a   :  { %v241_v56 = vadd.f32 1e-20, %v177_v52 }
  0x4b   :  { %v243_v57 = vadd.f32 1e-20, %v219_v53 }
  0x4c   :  { %593 = vrsqrt.f32 %v241_v56 }
  0x4d   :  { %595 = vrsqrt.f32 %v243_v57 }
  0x4e   :  { %597 = vrsqrt.f32 %v242_v58 }
  0x4f   :  { %599 = vrsqrt.f32 %v244_v59 }
  0x56   :  { %v594_v60 = vpop.eup %593 }
  0x57   :  { %v596_v61 = vpop.eup %595 }
  0x58   :  { %v598_v62 = vpop.eup %597 }
  0x59   :  { %v600_v63 = vpop.eup %599 }
  0xa4   :  { %v717_v27 = vpop.permute.xlu0 %481 }
  0xa5   :  { %vm483_vm0 = vcmp.eq.s32.totalorder %v469_v25, %v717_v27  ;;  %vm484_vm2 = vcmp.eq.s32.totalorder %v470_v26, %v717_v27  ;;  %vm485_vm5 = vcmp.eq.s32.totalorder %v719_v28, %v717_v27  ;;  %vm486_vm8 = vcmp.eq.s32.totalorder %v721_v29, %v717_v27 }
 0x111   :  { %v316_v0 = vpop.f32.mrb[0].mxu0 }
 0x112   :  { %v392_v1 = vmul.f32 %v594_v60, %v316_v0  ;;  %v387_v2 = vpop.f32.mrb[0].mxu1  ;;  %v318_v3 = vpop.f32.mrb[1].mxu0 }
 0x113   :  { %v394_v4 = vmul.f32 %v596_v61, %v387_v2  ;;  %v393_v5 = vmul.f32 %v598_v62, %v318_v3  ;;  %v389_v6 = vpop.f32.mrb[1].mxu1 }
 0x114   :  { %v701_v7 = vclamps-f32 %v392_v1, 1.0  ;;  %v395_v8 = vmul.f32 %v600_v63, %v389_v6 }
 0x115   :  { %v703_v9 = vclamps-f32 %v394_v4, 1.0  ;;  %v705_v10 = vclamps-f32 %v393_v5, 1.0 }
 0x116   :  { %v404_v11 = vmul.f32 %v701_v7, %v701_v7  ;;  %v709_v12 = vclamps-f32 %v395_v8, 1.0  ;;  %v444_v30 = vmul.f32 0.87758255, %v701_v7  ;;  %v518_v32 = vadd.f32 -0.23971277, %v701_v7 }
 0x117   :  { %v406_v13 = vmul.f32 %v703_v9, %v703_v9  ;;  %v405_v14 = vmul.f32 %v705_v10, %v705_v10  ;;  %v446_v31 = vmul.f32 0.87758255, %v703_v9  ;;  %v445_v34 = vmul.f32 0.87758255, %v705_v10 }
 0x118   :  { %v408_v15 = vsub.f32 1.0, %v404_v11  ;;  %v407_v16 = vmul.f32 %v709_v12, %v709_v12  ;;  %v447_v35 = vmul.f32 0.87758255, %v709_v12  ;;  %v519_v59 = vadd.f32 -0.23971277, %v705_v10 }
 0x119   :  { %v410_v17 = vsub.f32 1.0, %v406_v13  ;;  %v409_v18 = vsub.f32 1.0, %v405_v14  ;;  %v520_v62 = vadd.f32 -0.23971277, %v703_v9  ;;  %vm460_vm12 = vcmp.le.f32.partialorder %v701_v7, -0.87758255 }
 0x11a   :  { %v412_v19 = vmax.f32 %v408_v15, 0.0  ;;  %v411_v20 = vsub.f32 1.0, %v407_v16  ;;  %v521_v0 = vadd.f32 -0.23971277, %v709_v12  ;;  %vm461_vm13 = vcmp.le.f32.partialorder %v705_v10, -0.87758255 }
 0x11b   :  { %v414_v22 = vmax.f32 %v410_v17, 0.0  ;;  %v413_v23 = vmax.f32 %v409_v18, 0.0  ;;  %vm462_vm14 = vcmp.le.f32.partialorder %v703_v9, -0.87758255  ;;  %vm463_vm15 = vcmp.le.f32.partialorder %v709_v12, -0.87758255 }
 0x11c   :  { %v415_v24 = vmax.f32 %v411_v20, 0.0  ;;  %601 = vrsqrt.f32 %v412_v19  ;;  %vm418_vm1 = vcmp.eq.f32.partialorder %v412_v19, inf  ;;  %vm420_vm3 = vcmp.eq.f32.partialorder %v412_v19, 0.0 }
 0x11d   :  { %603 = vrsqrt.f32 %v413_v23  ;;  %v421_v38 = vand.u32 2147483648, %v412_v19  ;;  %vm425_vm4 = vcmp.eq.f32.partialorder %v413_v23, inf  ;;  %vm427_vm6 = vcmp.eq.f32.partialorder %v413_v23, 0.0 }
 0x11e   :  { %605 = vrsqrt.f32 %v414_v22  ;;  %v428_v41 = vand.u32 2147483648, %v413_v23  ;;  %vm432_vm7 = vcmp.eq.f32.partialorder %v414_v22, inf  ;;  %vm434_vm9 = vcmp.eq.f32.partialorder %v414_v22, 0.0 }
 0x11f   :  { %607 = vrsqrt.f32 %v415_v24  ;;  %v435_v45 = vand.u32 2147483648, %v414_v22  ;;  %vm439_vm10 = vcmp.eq.f32.partialorder %v415_v24, inf  ;;  %v442_v51 = vand.u32 2147483648, %v415_v24 }
 0x120   :  { %vm441_vm11 = vcmp.eq.f32.partialorder %v415_v24, 0.0 }
 0x126   :  { %v602_v33 = vpop.eup %601 }
 0x127   :  { %v604_v36 = vpop.eup %603  ;;  %v417_v37 = vmul.f32 %v602_v33, %v412_v19 }
 0x128   :  { %v606_v39 = vpop.eup %605  ;;  %v424_v40 = vmul.f32 %v604_v36, %v413_v23 }
 0x129   :  { %v608_v42 = vpop.eup %607  ;;  %v419_v43 = vsel %vm418_vm1, %v412_v19, %v417_v37  ;;  %v431_v44 = vmul.f32 %v606_v39, %v414_v22 }
 0x12a   :  { %v422_v46 = vsel %vm420_vm3, %v421_v38, %v419_v43  ;;  %v426_v47 = vsel %vm425_vm4, %v413_v23, %v424_v40  ;;  %v438_v48 = vmul.f32 %v608_v42, %v415_v24 }
 0x12b   :  { %v429_v49 = vsel %vm427_vm6, %v428_v41, %v426_v47  ;;  %v433_v50 = vsel %vm432_vm7, %v414_v22, %v431_v44  ;;  %v448_v52 = vmul.f32 0.47942555, %v422_v46 }
 0x12c   :  { %v436_v53 = vsel %vm434_vm9, %v435_v45, %v433_v50  ;;  %v440_v54 = vsel %vm439_vm10, %v415_v24, %v438_v48  ;;  %v449_v55 = vmul.f32 0.47942555, %v429_v49 }
 0x12d   :  { %v443_v56 = vsel %vm441_vm11, %v442_v51, %v440_v54  ;;  %v450_v57 = vmul.f32 0.47942555, %v436_v53  ;;  %v452_v58 = vsub.f32 %v444_v30, %v448_v52 }
 0x12e   :  { %v451_v60 = vmul.f32 0.47942555, %v443_v56  ;;  %v453_v61 = vsub.f32 %v445_v34, %v449_v55 }
 0x12f   :  { %v454_v63 = vsub.f32 %v446_v31, %v450_v57  ;;  %v464_v1 = vsel %vm460_vm12, %v518_v32, %v452_v58 }
 0x130   :  { %v455_v2 = vsub.f32 %v447_v35, %v451_v60  ;;  %v465_v3 = vsel %vm461_vm13, %v519_v59, %v453_v61  ;;  %v487_v4 = vsel %vm483_vm0, %v464_v1, %v701_v7 }
 0x131   :  { %v466_v5 = vsel %vm462_vm14, %v520_v62, %v454_v63  ;;  %v488_v6 = vsel %vm484_vm2, %v465_v3, %v705_v10  ;;  %v491_v8 = vmul.f32 64.0, %v487_v4 }
 0x132   :  { %v467_v11 = vsel %vm463_vm15, %v521_v0, %v455_v2  ;;  %v489_v13 = vsel %vm485_vm5, %v466_v5, %v703_v9  ;;  %v492_v14 = vmul.f32 64.0, %v488_v6 }
 0x133   :  { %v490_v7 = vsel %vm486_vm8, %v467_v11, %v709_v12  ;;  %v493_v15 = vmul.f32 64.0, %v489_v13  ;;  %495 = vst [vmem:[#allocation5] sm:$0xff] %v491_v8 }
 0x134   :  { %v494_v16 = vmul.f32 64.0, %v490_v7  ;;  %496 = vst [vmem:[#allocation5 + $0x8] sm:$0xff] %v492_v14 }
 0x135   :  { %497 = vst [vmem:[#allocation5 + $0x10] sm:$0xff] %v493_v15 }
 0x136   :  { %498 = vst [vmem:[#allocation5 + $0x18] sm:$0xff] %v494_v16 }
 0x137   :  { %642 = shalt.err (!%p639_p12)
}
 0x138   :  { %s643_s5 = scalar_lea.hbm %s770_s3, 512 }
 0x139   :  { %p644_p13 = scmp.ne.s32.totalorder %s770_s3, %s643_s5  ;;  %p647_p0 = scmp.lt.u32.totalorder %s643_s5, %s770_s3 }
 0x13b   :  { %p649_p1 = pnand %p647_p0, %p644_p13 }
 0x13d   :  { %652 = shalt.err (!%p649_p1)
}
 0x13e   :  { %508 = dma.vmem_to_hbm [thread:$0]  %s506_s28, 512, %s770_s3, [#allocation4]  }
 0x13f   :  { %655 = dma.done.wait [#allocation4], 512  }
 0x140   :  { %656 = vsyncadd [#allocation4], 4294966784 }
 0x141   :  { %512 = vsyncpa [#allocation3], 1 }
 0x142   :  { %513 = vsyncpa [#allocation4], 1 }

</bundles_post_ra>
